<compile_context>
chip_gen: v7x
topology: tpu7x:2x2x1
jax: 0.10.0
libtpu: 0.0.40
codegen_flags: <defaults>
</compile_context>

<pallas_src>
import jax
import jax.numpy as jnp
from jax.experimental import pallas as pl
from jax.experimental.pallas import tpu as pltpu


def _dropout_p0_dma_kernel(x_hbm_ref, o_hbm_ref, sem):
    # Dropout(p=0.0) == identity: one HBM->HBM DMA of the whole tensor.
    cp = pltpu.make_async_copy(x_hbm_ref, o_hbm_ref, sem)
    cp.start()
    cp.wait()


def dropout_p0(x: jax.Array) -> jax.Array:
    """nn.Dropout(p=0.0) semantics (identity) as a single-DMA Pallas kernel."""
    return pl.pallas_call(
        _dropout_p0_dma_kernel,
        out_shape=jax.ShapeDtypeStruct(x.shape, x.dtype),
        # Raw HBM refs on both sides; the kernel moves the data itself.
        in_specs=[pl.BlockSpec(memory_space=pl.ANY)],
        out_specs=pl.BlockSpec(memory_space=pl.ANY),
        scratch_shapes=[pltpu.SemaphoreType.DMA],
    )(x)


if __name__ == "__main__":
    key = jax.random.PRNGKey(0)
    # Shape implied by the module's forward: (1, 28, 28, 192) channels-last.
    x100 = jax.random.normal(key, (1, 28, 28, 192), dtype=jnp.float32)

    x101 = dropout_p0(x100)
    jax.block_until_ready(x101)

    # Sanity check: dropout with p=0.0 is exactly the identity.
    assert x101.shape == x100.shape
    assert x101.dtype == x100.dtype
    assert bool(jnp.all(x101 == x100))

    print("KERNEL_OK")
</pallas_src>

<mosaic_0001>
module attributes {stable_mosaic.version = 11 : i64} {
  func.func @_dropout_p0_dma_kernel(%arg0: memref<1x28x28x192xf32, #tpu.memory_space<any>>, %arg1: memref<1x28x28x192xf32, #tpu.memory_space<any>>, %arg2: memref<!tpu.dma_semaphore, #tpu.memory_space<semaphore_mem>>) attributes {dimension_semantics = [], scalar_prefetch = 0 : i64, scratch_operands = 1 : i64, tpu.core_type = #tpu.core_type<tc>} {
    tpu.enqueue_dma source(%arg0 : memref<1x28x28x192xf32, #tpu.memory_space<any>>) target(%arg1 : memref<1x28x28x192xf32, #tpu.memory_space<any>>) target_semaphore(%arg2 : memref<!tpu.dma_semaphore, #tpu.memory_space<semaphore_mem>>)
    tpu.wait_dma2 semaphore(%arg2 : memref<!tpu.dma_semaphore, #tpu.memory_space<semaphore_mem>>) src(%arg0 : memref<1x28x28x192xf32, #tpu.memory_space<any>>) dst(%arg1 : memref<1x28x28x192xf32, #tpu.memory_space<any>>)
    return
  }
}

</mosaic_0001>

<bundles_post_ra>
// kernel: tpu_custom_call.1
= control target key start
LH: loop header
LB: loop body
LE: loop exit
PB: predicated region body
PF: predicated region fallthrough
CT: control target
= control target key end

     0   :  { %s1871_s0 = inlined_call_operand.vmem [shape: f32[1,28,28,192], index: 0, kind: input, shape index: {}]   ;;  %s1872_s1 = inlined_call_operand.vmem [shape: f32[1,28,28,192], index: 1, kind: output, shape index: {}]  }
   0x1   :  { %v38_v0 = vld [vmem:[%s1871_s0] sm:$0xff]  ;;  %v40_v1 = vld [vmem:[%s1871_s0 + $0x8] sm:$0xff]  ;;  %v42_v2 = vld [vmem:[%s1871_s0 + $0x10] sm:$0xff] }
   0x2   :  { %39 = vst [vmem:[%s1872_s1] sm:$0xff] %v38_v0  ;;  %41 = vst [vmem:[%s1872_s1 + $0x8] sm:$0xff] %v40_v1  ;;  %v44_v3 = vld [vmem:[%s1871_s0 + $0x18] sm:$0xff]  ;;  %v46_v4 = vld [vmem:[%s1871_s0 + $0x20] sm:$0xff] }
   0x3   :  { %43 = vst [vmem:[%s1872_s1 + $0x10] sm:$0xff] %v42_v2  ;;  %v48_v5 = vld [vmem:[%s1871_s0 + $0x28] sm:$0xff]  ;;  %45 = vst [vmem:[%s1872_s1 + $0x18] sm:$0xff] %v44_v3  ;;  %v50_v6 = vld [vmem:[%s1871_s0 + $0x30] sm:$0xff] }
   0x4   :  { %47 = vst [vmem:[%s1872_s1 + $0x20] sm:$0xff] %v46_v4  ;;  %49 = vst [vmem:[%s1872_s1 + $0x28] sm:$0xff] %v48_v5  ;;  %v52_v7 = vld [vmem:[%s1871_s0 + $0x38] sm:$0xff]  ;;  %v54_v8 = vld [vmem:[%s1871_s0 + $0x40] sm:$0xff] }
   0x5   :  { %51 = vst [vmem:[%s1872_s1 + $0x30] sm:$0xff] %v50_v6  ;;  %53 = vst [vmem:[%s1872_s1 + $0x38] sm:$0xff] %v52_v7  ;;  %v56_v9 = vld [vmem:[%s1871_s0 + $0x48] sm:$0xff]  ;;  %v58_v10 = vld [vmem:[%s1871_s0 + $0x50] sm:$0xff] }
   0x6   :  { %55 = vst [vmem:[%s1872_s1 + $0x40] sm:$0xff] %v54_v8  ;;  %v60_v11 = vld [vmem:[%s1871_s0 + $0x58] sm:$0xff]  ;;  %57 = vst [vmem:[%s1872_s1 + $0x48] sm:$0xff] %v56_v9  ;;  %v62_v12 = vld [vmem:[%s1871_s0 + $0x60] sm:$0xff] }
   0x7   :  { %59 = vst [vmem:[%s1872_s1 + $0x50] sm:$0xff] %v58_v10  ;;  %61 = vst [vmem:[%s1872_s1 + $0x58] sm:$0xff] %v60_v11  ;;  %v64_v13 = vld [vmem:[%s1871_s0 + $0x68] sm:$0xff]  ;;  %v66_v14 = vld [vmem:[%s1871_s0 + $0x70] sm:$0xff] }
   0x8   :  { %63 = vst [vmem:[%s1872_s1 + $0x60] sm:$0xff] %v62_v12  ;;  %65 = vst [vmem:[%s1872_s1 + $0x68] sm:$0xff] %v64_v13  ;;  %v68_v15 = vld [vmem:[%s1871_s0 + $0x78] sm:$0xff]  ;;  %v70_v16 = vld [vmem:[%s1871_s0 + $0x80] sm:$0xff] }
   0x9   :  { %67 = vst [vmem:[%s1872_s1 + $0x70] sm:$0xff] %v66_v14  ;;  %v72_v17 = vld [vmem:[%s1871_s0 + $0x88] sm:$0xff]  ;;  %69 = vst [vmem:[%s1872_s1 + $0x78] sm:$0xff] %v68_v15  ;;  %v74_v18 = vld [vmem:[%s1871_s0 + $0x90] sm:$0xff] }
   0xa   :  { %71 = vst [vmem:[%s1872_s1 + $0x80] sm:$0xff] %v70_v16  ;;  %73 = vst [vmem:[%s1872_s1 + $0x88] sm:$0xff] %v72_v17  ;;  %v76_v19 = vld [vmem:[%s1871_s0 + $0x98] sm:$0xff]  ;;  %v78_v20 = vld [vmem:[%s1871_s0 + $0xa0] sm:$0xff] }
   0xb   :  { %75 = vst [vmem:[%s1872_s1 + $0x90] sm:$0xff] %v74_v18  ;;  %77 = vst [vmem:[%s1872_s1 + $0x98] sm:$0xff] %v76_v19  ;;  %v80_v21 = vld [vmem:[%s1871_s0 + $0xa8] sm:$0xff]  ;;  %v82_v22 = vld [vmem:[%s1871_s0 + $0xb0] sm:$0xff] }
   0xc   :  { %79 = vst [vmem:[%s1872_s1 + $0xa0] sm:$0xff] %v78_v20  ;;  %v84_v23 = vld [vmem:[%s1871_s0 + $0xb8] sm:$0xff]  ;;  %81 = vst [vmem:[%s1872_s1 + $0xa8] sm:$0xff] %v80_v21  ;;  %v86_v24 = vld [vmem:[%s1871_s0 + $0xc0] sm:$0xff] }
   0xd   :  { %83 = vst [vmem:[%s1872_s1 + $0xb0] sm:$0xff] %v82_v22  ;;  %85 = vst [vmem:[%s1872_s1 + $0xb8] sm:$0xff] %v84_v23  ;;  %v88_v25 = vld [vmem:[%s1871_s0 + $0xc8] sm:$0xff]  ;;  %v90_v26 = vld [vmem:[%s1871_s0 + $0xd0] sm:$0xff] }
   0xe   :  { %87 = vst [vmem:[%s1872_s1 + $0xc0] sm:$0xff] %v86_v24  ;;  %89 = vst [vmem:[%s1872_s1 + $0xc8] sm:$0xff] %v88_v25  ;;  %v92_v27 = vld [vmem:[%s1871_s0 + $0xd8] sm:$0xff]  ;;  %v94_v28 = vld [vmem:[%s1871_s0 + $0xe0] sm:$0xff] }
   0xf   :  { %91 = vst [vmem:[%s1872_s1 + $0xd0] sm:$0xff] %v90_v26  ;;  %v96_v29 = vld [vmem:[%s1871_s0 + $0xe8] sm:$0xff]  ;;  %93 = vst [vmem:[%s1872_s1 + $0xd8] sm:$0xff] %v92_v27  ;;  %v98_v30 = vld [vmem:[%s1871_s0 + $0xf0] sm:$0xff] }
  0x10   :  { %95 = vst [vmem:[%s1872_s1 + $0xe0] sm:$0xff] %v94_v28  ;;  %97 = vst [vmem:[%s1872_s1 + $0xe8] sm:$0xff] %v96_v29  ;;  %v100_v31 = vld [vmem:[%s1871_s0 + $0xf8] sm:$0xff]  ;;  %v102_v32 = vld [vmem:[%s1871_s0 + $0x100] sm:$0xff] }
  0x11   :  { %99 = vst [vmem:[%s1872_s1 + $0xf0] sm:$0xff] %v98_v30  ;;  %101 = vst [vmem:[%s1872_s1 + $0xf8] sm:$0xff] %v100_v31  ;;  %v104_v33 = vld [vmem:[%s1871_s0 + $0x108] sm:$0xff]  ;;  %v106_v34 = vld [vmem:[%s1871_s0 + $0x110] sm:$0xff] }
  0x12   :  { %103 = vst [vmem:[%s1872_s1 + $0x100] sm:$0xff] %v102_v32  ;;  %v108_v35 = vld [vmem:[%s1871_s0 + $0x118] sm:$0xff]  ;;  %105 = vst [vmem:[%s1872_s1 + $0x108] sm:$0xff] %v104_v33  ;;  %v110_v36 = vld [vmem:[%s1871_s0 + $0x120] sm:$0xff] }
  0x13   :  { %107 = vst [vmem:[%s1872_s1 + $0x110] sm:$0xff] %v106_v34  ;;  %109 = vst [vmem:[%s1872_s1 + $0x118] sm:$0xff] %v108_v35  ;;  %v112_v37 = vld [vmem:[%s1871_s0 + $0x128] sm:$0xff]  ;;  %v114_v38 = vld [vmem:[%s1871_s0 + $0x130] sm:$0xff] }
  0x14   :  { %111 = vst [vmem:[%s1872_s1 + $0x120] sm:$0xff] %v110_v36  ;;  %113 = vst [vmem:[%s1872_s1 + $0x128] sm:$0xff] %v112_v37  ;;  %v116_v39 = vld [vmem:[%s1871_s0 + $0x138] sm:$0xff]  ;;  %v118_v40 = vld [vmem:[%s1871_s0 + $0x140] sm:$0xff] }
  0x15   :  { %115 = vst [vmem:[%s1872_s1 + $0x130] sm:$0xff] %v114_v38  ;;  %v120_v41 = vld [vmem:[%s1871_s0 + $0x148] sm:$0xff]  ;;  %117 = vst [vmem:[%s1872_s1 + $0x138] sm:$0xff] %v116_v39  ;;  %v122_v42 = vld [vmem:[%s1871_s0 + $0x150] sm:$0xff] }
  0x16   :  { %119 = vst [vmem:[%s1872_s1 + $0x140] sm:$0xff] %v118_v40  ;;  %121 = vst [vmem:[%s1872_s1 + $0x148] sm:$0xff] %v120_v41  ;;  %v124_v43 = vld [vmem:[%s1871_s0 + $0x158] sm:$0xff]  ;;  %v126_v44 = vld [vmem:[%s1871_s0 + $0x160] sm:$0xff] }
  0x17   :  { %123 = vst [vmem:[%s1872_s1 + $0x150] sm:$0xff] %v122_v42  ;;  %125 = vst [vmem:[%s1872_s1 + $0x158] sm:$0xff] %v124_v43  ;;  %v128_v45 = vld [vmem:[%s1871_s0 + $0x168] sm:$0xff]  ;;  %v130_v46 = vld [vmem:[%s1871_s0 + $0x170] sm:$0xff] }
  0x18   :  { %127 = vst [vmem:[%s1872_s1 + $0x160] sm:$0xff] %v126_v44  ;;  %v132_v47 = vld [vmem:[%s1871_s0 + $0x178] sm:$0xff]  ;;  %129 = vst [vmem:[%s1872_s1 + $0x168] sm:$0xff] %v128_v45  ;;  %v134_v48 = vld [vmem:[%s1871_s0 + $0x180] sm:$0xff] }
  0x19   :  { %131 = vst [vmem:[%s1872_s1 + $0x170] sm:$0xff] %v130_v46  ;;  %133 = vst [vmem:[%s1872_s1 + $0x178] sm:$0xff] %v132_v47  ;;  %v136_v49 = vld [vmem:[%s1871_s0 + $0x188] sm:$0xff]  ;;  %v138_v50 = vld [vmem:[%s1871_s0 + $0x190] sm:$0xff] }
  0x1a   :  { %135 = vst [vmem:[%s1872_s1 + $0x180] sm:$0xff] %v134_v48  ;;  %137 = vst [vmem:[%s1872_s1 + $0x188] sm:$0xff] %v136_v49  ;;  %v140_v51 = vld [vmem:[%s1871_s0 + $0x198] sm:$0xff]  ;;  %v142_v52 = vld [vmem:[%s1871_s0 + $0x1a0] sm:$0xff] }
  0x1b   :  { %139 = vst [vmem:[%s1872_s1 + $0x190] sm:$0xff] %v138_v50  ;;  %v144_v53 = vld [vmem:[%s1871_s0 + $0x1a8] sm:$0xff]  ;;  %141 = vst [vmem:[%s1872_s1 + $0x198] sm:$0xff] %v140_v51  ;;  %v146_v54 = vld [vmem:[%s1871_s0 + $0x1b0] sm:$0xff] }
  0x1c   :  { %143 = vst [vmem:[%s1872_s1 + $0x1a0] sm:$0xff] %v142_v52  ;;  %145 = vst [vmem:[%s1872_s1 + $0x1a8] sm:$0xff] %v144_v53  ;;  %v148_v55 = vld [vmem:[%s1871_s0 + $0x1b8] sm:$0xff]  ;;  %v150_v56 = vld [vmem:[%s1871_s0 + $0x1c0] sm:$0xff] }
  0x1d   :  { %147 = vst [vmem:[%s1872_s1 + $0x1b0] sm:$0xff] %v146_v54  ;;  %149 = vst [vmem:[%s1872_s1 + $0x1b8] sm:$0xff] %v148_v55  ;;  %v152_v57 = vld [vmem:[%s1871_s0 + $0x1c8] sm:$0xff]  ;;  %v154_v58 = vld [vmem:[%s1871_s0 + $0x1d0] sm:$0xff] }
  0x1e   :  { %151 = vst [vmem:[%s1872_s1 + $0x1c0] sm:$0xff] %v150_v56  ;;  %v156_v59 = vld [vmem:[%s1871_s0 + $0x1d8] sm:$0xff]  ;;  %153 = vst [vmem:[%s1872_s1 + $0x1c8] sm:$0xff] %v152_v57  ;;  %v158_v60 = vld [vmem:[%s1871_s0 + $0x1e0] sm:$0xff] }
  0x1f   :  { %155 = vst [vmem:[%s1872_s1 + $0x1d0] sm:$0xff] %v154_v58  ;;  %157 = vst [vmem:[%s1872_s1 + $0x1d8] sm:$0xff] %v156_v59  ;;  %v160_v61 = vld [vmem:[%s1871_s0 + $0x1e8] sm:$0xff]  ;;  %v162_v62 = vld [vmem:[%s1871_s0 + $0x1f0] sm:$0xff] }
  0x20   :  { %159 = vst [vmem:[%s1872_s1 + $0x1e0] sm:$0xff] %v158_v60  ;;  %161 = vst [vmem:[%s1872_s1 + $0x1e8] sm:$0xff] %v160_v61  ;;  %v164_v63 = vld [vmem:[%s1871_s0 + $0x1f8] sm:$0xff]  ;;  %v166_v0 = vld [vmem:[%s1871_s0 + $0x200] sm:$0xff] }
  0x21   :  { %163 = vst [vmem:[%s1872_s1 + $0x1f0] sm:$0xff] %v162_v62  ;;  %v168_v1 = vld [vmem:[%s1871_s0 + $0x208] sm:$0xff]  ;;  %165 = vst [vmem:[%s1872_s1 + $0x1f8] sm:$0xff] %v164_v63  ;;  %v170_v2 = vld [vmem:[%s1871_s0 + $0x210] sm:$0xff] }
  0x22   :  { %167 = vst [vmem:[%s1872_s1 + $0x200] sm:$0xff] %v166_v0  ;;  %169 = vst [vmem:[%s1872_s1 + $0x208] sm:$0xff] %v168_v1  ;;  %v172_v3 = vld [vmem:[%s1871_s0 + $0x218] sm:$0xff]  ;;  %v174_v4 = vld [vmem:[%s1871_s0 + $0x220] sm:$0xff] }
  0x23   :  { %171 = vst [vmem:[%s1872_s1 + $0x210] sm:$0xff] %v170_v2  ;;  %173 = vst [vmem:[%s1872_s1 + $0x218] sm:$0xff] %v172_v3  ;;  %v176_v5 = vld [vmem:[%s1871_s0 + $0x228] sm:$0xff]  ;;  %v178_v6 = vld [vmem:[%s1871_s0 + $0x230] sm:$0xff] }
  0x24   :  { %175 = vst [vmem:[%s1872_s1 + $0x220] sm:$0xff] %v174_v4  ;;  %v180_v7 = vld [vmem:[%s1871_s0 + $0x238] sm:$0xff]  ;;  %177 = vst [vmem:[%s1872_s1 + $0x228] sm:$0xff] %v176_v5  ;;  %v182_v8 = vld [vmem:[%s1871_s0 + $0x240] sm:$0xff] }
  0x25   :  { %179 = vst [vmem:[%s1872_s1 + $0x230] sm:$0xff] %v178_v6  ;;  %181 = vst [vmem:[%s1872_s1 + $0x238] sm:$0xff] %v180_v7  ;;  %v184_v9 = vld [vmem:[%s1871_s0 + $0x248] sm:$0xff]  ;;  %v186_v10 = vld [vmem:[%s1871_s0 + $0x250] sm:$0xff] }
  0x26   :  { %183 = vst [vmem:[%s1872_s1 + $0x240] sm:$0xff] %v182_v8  ;;  %185 = vst [vmem:[%s1872_s1 + $0x248] sm:$0xff] %v184_v9  ;;  %v188_v11 = vld [vmem:[%s1871_s0 + $0x258] sm:$0xff]  ;;  %v190_v12 = vld [vmem:[%s1871_s0 + $0x260] sm:$0xff] }
  0x27   :  { %187 = vst [vmem:[%s1872_s1 + $0x250] sm:$0xff] %v186_v10  ;;  %v192_v13 = vld [vmem:[%s1871_s0 + $0x268] sm:$0xff]  ;;  %189 = vst [vmem:[%s1872_s1 + $0x258] sm:$0xff] %v188_v11  ;;  %v194_v14 = vld [vmem:[%s1871_s0 + $0x270] sm:$0xff] }
  0x28   :  { %191 = vst [vmem:[%s1872_s1 + $0x260] sm:$0xff] %v190_v12  ;;  %193 = vst [vmem:[%s1872_s1 + $0x268] sm:$0xff] %v192_v13  ;;  %v196_v15 = vld [vmem:[%s1871_s0 + $0x278] sm:$0xff]  ;;  %v198_v16 = vld [vmem:[%s1871_s0 + $0x280] sm:$0xff] }
  0x29   :  { %195 = vst [vmem:[%s1872_s1 + $0x270] sm:$0xff] %v194_v14  ;;  %197 = vst [vmem:[%s1872_s1 + $0x278] sm:$0xff] %v196_v15  ;;  %v200_v17 = vld [vmem:[%s1871_s0 + $0x288] sm:$0xff]  ;;  %v202_v18 = vld [vmem:[%s1871_s0 + $0x290] sm:$0xff] }
  0x2a   :  { %199 = vst [vmem:[%s1872_s1 + $0x280] sm:$0xff] %v198_v16  ;;  %v204_v19 = vld [vmem:[%s1871_s0 + $0x298] sm:$0xff]  ;;  %201 = vst [vmem:[%s1872_s1 + $0x288] sm:$0xff] %v200_v17  ;;  %v206_v20 = vld [vmem:[%s1871_s0 + $0x2a0] sm:$0xff] }
  0x2b   :  { %203 = vst [vmem:[%s1872_s1 + $0x290] sm:$0xff] %v202_v18  ;;  %205 = vst [vmem:[%s1872_s1 + $0x298] sm:$0xff] %v204_v19  ;;  %v208_v21 = vld [vmem:[%s1871_s0 + $0x2a8] sm:$0xff]  ;;  %v210_v22 = vld [vmem:[%s1871_s0 + $0x2b0] sm:$0xff] }
  0x2c   :  { %207 = vst [vmem:[%s1872_s1 + $0x2a0] sm:$0xff] %v206_v20  ;;  %209 = vst [vmem:[%s1872_s1 + $0x2a8] sm:$0xff] %v208_v21  ;;  %v212_v23 = vld [vmem:[%s1871_s0 + $0x2b8] sm:$0xff]  ;;  %v214_v24 = vld [vmem:[%s1871_s0 + $0x2c0] sm:$0xff] }
  0x2d   :  { %211 = vst [vmem:[%s1872_s1 + $0x2b0] sm:$0xff] %v210_v22  ;;  %v216_v25 = vld [vmem:[%s1871_s0 + $0x2c8] sm:$0xff]  ;;  %213 = vst [vmem:[%s1872_s1 + $0x2b8] sm:$0xff] %v212_v23  ;;  %v218_v26 = vld [vmem:[%s1871_s0 + $0x2d0] sm:$0xff] }
  0x2e   :  { %215 = vst [vmem:[%s1872_s1 + $0x2c0] sm:$0xff] %v214_v24  ;;  %217 = vst [vmem:[%s1872_s1 + $0x2c8] sm:$0xff] %v216_v25  ;;  %v220_v27 = vld [vmem:[%s1871_s0 + $0x2d8] sm:$0xff]  ;;  %v222_v28 = vld [vmem:[%s1871_s0 + $0x2e0] sm:$0xff] }
  0x2f   :  { %219 = vst [vmem:[%s1872_s1 + $0x2d0] sm:$0xff] %v218_v26  ;;  %221 = vst [vmem:[%s1872_s1 + $0x2d8] sm:$0xff] %v220_v27  ;;  %v224_v29 = vld [vmem:[%s1871_s0 + $0x2e8] sm:$0xff]  ;;  %v226_v30 = vld [vmem:[%s1871_s0 + $0x2f0] sm:$0xff] }
  0x30   :  { %223 = vst [vmem:[%s1872_s1 + $0x2e0] sm:$0xff] %v222_v28  ;;  %v228_v31 = vld [vmem:[%s1871_s0 + $0x2f8] sm:$0xff]  ;;  %225 = vst [vmem:[%s1872_s1 + $0x2e8] sm:$0xff] %v224_v29  ;;  %v230_v32 = vld [vmem:[%s1871_s0 + $0x300] sm:$0xff] }
  0x31   :  { %227 = vst [vmem:[%s1872_s1 + $0x2f0] sm:$0xff] %v226_v30  ;;  %229 = vst [vmem:[%s1872_s1 + $0x2f8] sm:$0xff] %v228_v31  ;;  %v232_v33 = vld [vmem:[%s1871_s0 + $0x308] sm:$0xff]  ;;  %v234_v34 = vld [vmem:[%s1871_s0 + $0x310] sm:$0xff] }
  0x32   :  { %231 = vst [vmem:[%s1872_s1 + $0x300] sm:$0xff] %v230_v32  ;;  %233 = vst [vmem:[%s1872_s1 + $0x308] sm:$0xff] %v232_v33  ;;  %v236_v35 = vld [vmem:[%s1871_s0 + $0x318] sm:$0xff]  ;;  %v238_v36 = vld [vmem:[%s1871_s0 + $0x320] sm:$0xff] }
  0x33   :  { %235 = vst [vmem:[%s1872_s1 + $0x310] sm:$0xff] %v234_v34  ;;  %v240_v37 = vld [vmem:[%s1871_s0 + $0x328] sm:$0xff]  ;;  %237 = vst [vmem:[%s1872_s1 + $0x318] sm:$0xff] %v236_v35  ;;  %v242_v38 = vld [vmem:[%s1871_s0 + $0x330] sm:$0xff] }
  0x34   :  { %239 = vst [vmem:[%s1872_s1 + $0x320] sm:$0xff] %v238_v36  ;;  %241 = vst [vmem:[%s1872_s1 + $0x328] sm:$0xff] %v240_v37  ;;  %v244_v39 = vld [vmem:[%s1871_s0 + $0x338] sm:$0xff]  ;;  %v246_v40 = vld [vmem:[%s1871_s0 + $0x340] sm:$0xff] }
  0x35   :  { %243 = vst [vmem:[%s1872_s1 + $0x330] sm:$0xff] %v242_v38  ;;  %245 = vst [vmem:[%s1872_s1 + $0x338] sm:$0xff] %v244_v39  ;;  %v248_v41 = vld [vmem:[%s1871_s0 + $0x348] sm:$0xff]  ;;  %v250_v42 = vld [vmem:[%s1871_s0 + $0x350] sm:$0xff] }
  0x36   :  { %247 = vst [vmem:[%s1872_s1 + $0x340] sm:$0xff] %v246_v40  ;;  %v252_v43 = vld [vmem:[%s1871_s0 + $0x358] sm:$0xff]  ;;  %249 = vst [vmem:[%s1872_s1 + $0x348] sm:$0xff] %v248_v41  ;;  %v254_v44 = vld [vmem:[%s1871_s0 + $0x360] sm:$0xff] }
  0x37   :  { %251 = vst [vmem:[%s1872_s1 + $0x350] sm:$0xff] %v250_v42  ;;  %253 = vst [vmem:[%s1872_s1 + $0x358] sm:$0xff] %v252_v43  ;;  %v256_v45 = vld [vmem:[%s1871_s0 + $0x368] sm:$0xff]  ;;  %v258_v46 = vld [vmem:[%s1871_s0 + $0x370] sm:$0xff] }
  0x38   :  { %255 = vst [vmem:[%s1872_s1 + $0x360] sm:$0xff] %v254_v44  ;;  %257 = vst [vmem:[%s1872_s1 + $0x368] sm:$0xff] %v256_v45  ;;  %v260_v47 = vld [vmem:[%s1871_s0 + $0x378] sm:$0xff]  ;;  %v262_v48 = vld [vmem:[%s1871_s0 + $0x380] sm:$0xff] }
  0x39   :  { %259 = vst [vmem:[%s1872_s1 + $0x370] sm:$0xff] %v258_v46  ;;  %v264_v49 = vld [vmem:[%s1871_s0 + $0x388] sm:$0xff]  ;;  %261 = vst [vmem:[%s1872_s1 + $0x378] sm:$0xff] %v260_v47  ;;  %v266_v50 = vld [vmem:[%s1871_s0 + $0x390] sm:$0xff] }
  0x3a   :  { %263 = vst [vmem:[%s1872_s1 + $0x380] sm:$0xff] %v262_v48  ;;  %265 = vst [vmem:[%s1872_s1 + $0x388] sm:$0xff] %v264_v49  ;;  %v268_v51 = vld [vmem:[%s1871_s0 + $0x398] sm:$0xff]  ;;  %v270_v52 = vld [vmem:[%s1871_s0 + $0x3a0] sm:$0xff] }
  0x3b   :  { %267 = vst [vmem:[%s1872_s1 + $0x390] sm:$0xff] %v266_v50  ;;  %269 = vst [vmem:[%s1872_s1 + $0x398] sm:$0xff] %v268_v51  ;;  %v272_v53 = vld [vmem:[%s1871_s0 + $0x3a8] sm:$0xff]  ;;  %v274_v54 = vld [vmem:[%s1871_s0 + $0x3b0] sm:$0xff] }
  0x3c   :  { %271 = vst [vmem:[%s1872_s1 + $0x3a0] sm:$0xff] %v270_v52  ;;  %v276_v55 = vld [vmem:[%s1871_s0 + $0x3b8] sm:$0xff]  ;;  %273 = vst [vmem:[%s1872_s1 + $0x3a8] sm:$0xff] %v272_v53  ;;  %v278_v56 = vld [vmem:[%s1871_s0 + $0x3c0] sm:$0xff] }
  0x3d   :  { %275 = vst [vmem:[%s1872_s1 + $0x3b0] sm:$0xff] %v274_v54  ;;  %277 = vst [vmem:[%s1872_s1 + $0x3b8] sm:$0xff] %v276_v55  ;;  %v280_v57 = vld [vmem:[%s1871_s0 + $0x3c8] sm:$0xff]  ;;  %v282_v58 = vld [vmem:[%s1871_s0 + $0x3d0] sm:$0xff] }
  0x3e   :  { %279 = vst [vmem:[%s1872_s1 + $0x3c0] sm:$0xff] %v278_v56  ;;  %281 = vst [vmem:[%s1872_s1 + $0x3c8] sm:$0xff] %v280_v57  ;;  %v284_v59 = vld [vmem:[%s1871_s0 + $0x3d8] sm:$0xff]  ;;  %v286_v60 = vld [vmem:[%s1871_s0 + $0x3e0] sm:$0xff] }
  0x3f   :  { %283 = vst [vmem:[%s1872_s1 + $0x3d0] sm:$0xff] %v282_v58  ;;  %v288_v61 = vld [vmem:[%s1871_s0 + $0x3e8] sm:$0xff]  ;;  %285 = vst [vmem:[%s1872_s1 + $0x3d8] sm:$0xff] %v284_v59  ;;  %v290_v62 = vld [vmem:[%s1871_s0 + $0x3f0] sm:$0xff] }
  0x40   :  { %287 = vst [vmem:[%s1872_s1 + $0x3e0] sm:$0xff] %v286_v60  ;;  %289 = vst [vmem:[%s1872_s1 + $0x3e8] sm:$0xff] %v288_v61  ;;  %v292_v63 = vld [vmem:[%s1871_s0 + $0x3f8] sm:$0xff]  ;;  %v294_v0 = vld [vmem:[%s1871_s0 + $0x400] sm:$0xff] }
  0x41   :  { %291 = vst [vmem:[%s1872_s1 + $0x3f0] sm:$0xff] %v290_v62  ;;  %293 = vst [vmem:[%s1872_s1 + $0x3f8] sm:$0xff] %v292_v63  ;;  %v296_v1 = vld [vmem:[%s1871_s0 + $0x408] sm:$0xff]  ;;  %v298_v2 = vld [vmem:[%s1871_s0 + $0x410] sm:$0xff] }
  0x42   :  { %295 = vst [vmem:[%s1872_s1 + $0x400] sm:$0xff] %v294_v0  ;;  %v300_v3 = vld [vmem:[%s1871_s0 + $0x418] sm:$0xff]  ;;  %297 = vst [vmem:[%s1872_s1 + $0x408] sm:$0xff] %v296_v1  ;;  %v302_v4 = vld [vmem:[%s1871_s0 + $0x420] sm:$0xff] }
  0x43   :  { %299 = vst [vmem:[%s1872_s1 + $0x410] sm:$0xff] %v298_v2  ;;  %301 = vst [vmem:[%s1872_s1 + $0x418] sm:$0xff] %v300_v3  ;;  %v304_v5 = vld [vmem:[%s1871_s0 + $0x428] sm:$0xff]  ;;  %v306_v6 = vld [vmem:[%s1871_s0 + $0x430] sm:$0xff] }
  0x44   :  { %303 = vst [vmem:[%s1872_s1 + $0x420] sm:$0xff] %v302_v4  ;;  %305 = vst [vmem:[%s1872_s1 + $0x428] sm:$0xff] %v304_v5  ;;  %v308_v7 = vld [vmem:[%s1871_s0 + $0x438] sm:$0xff]  ;;  %v310_v8 = vld [vmem:[%s1871_s0 + $0x440] sm:$0xff] }
  0x45   :  { %307 = vst [vmem:[%s1872_s1 + $0x430] sm:$0xff] %v306_v6  ;;  %v312_v9 = vld [vmem:[%s1871_s0 + $0x448] sm:$0xff]  ;;  %309 = vst [vmem:[%s1872_s1 + $0x438] sm:$0xff] %v308_v7  ;;  %v314_v10 = vld [vmem:[%s1871_s0 + $0x450] sm:$0xff] }
  0x46   :  { %311 = vst [vmem:[%s1872_s1 + $0x440] sm:$0xff] %v310_v8  ;;  %313 = vst [vmem:[%s1872_s1 + $0x448] sm:$0xff] %v312_v9  ;;  %v316_v11 = vld [vmem:[%s1871_s0 + $0x458] sm:$0xff]  ;;  %v318_v12 = vld [vmem:[%s1871_s0 + $0x460] sm:$0xff] }
  0x47   :  { %315 = vst [vmem:[%s1872_s1 + $0x450] sm:$0xff] %v314_v10  ;;  %317 = vst [vmem:[%s1872_s1 + $0x458] sm:$0xff] %v316_v11  ;;  %v320_v13 = vld [vmem:[%s1871_s0 + $0x468] sm:$0xff]  ;;  %v322_v14 = vld [vmem:[%s1871_s0 + $0x470] sm:$0xff] }
  0x48   :  { %319 = vst [vmem:[%s1872_s1 + $0x460] sm:$0xff] %v318_v12  ;;  %v324_v15 = vld [vmem:[%s1871_s0 + $0x478] sm:$0xff]  ;;  %321 = vst [vmem:[%s1872_s1 + $0x468] sm:$0xff] %v320_v13  ;;  %v326_v16 = vld [vmem:[%s1871_s0 + $0x480] sm:$0xff] }
  0x49   :  { %323 = vst [vmem:[%s1872_s1 + $0x470] sm:$0xff] %v322_v14  ;;  %325 = vst [vmem:[%s1872_s1 + $0x478] sm:$0xff] %v324_v15  ;;  %v328_v17 = vld [vmem:[%s1871_s0 + $0x488] sm:$0xff]  ;;  %v330_v18 = vld [vmem:[%s1871_s0 + $0x490] sm:$0xff] }
  0x4a   :  { %327 = vst [vmem:[%s1872_s1 + $0x480] sm:$0xff] %v326_v16  ;;  %329 = vst [vmem:[%s1872_s1 + $0x488] sm:$0xff] %v328_v17  ;;  %v332_v19 = vld [vmem:[%s1871_s0 + $0x498] sm:$0xff]  ;;  %v334_v20 = vld [vmem:[%s1871_s0 + $0x4a0] sm:$0xff] }
  0x4b   :  { %331 = vst [vmem:[%s1872_s1 + $0x490] sm:$0xff] %v330_v18  ;;  %v336_v21 = vld [vmem:[%s1871_s0 + $0x4a8] sm:$0xff]  ;;  %333 = vst [vmem:[%s1872_s1 + $0x498] sm:$0xff] %v332_v19  ;;  %v338_v22 = vld [vmem:[%s1871_s0 + $0x4b0] sm:$0xff] }
  0x4c   :  { %335 = vst [vmem:[%s1872_s1 + $0x4a0] sm:$0xff] %v334_v20  ;;  %337 = vst [vmem:[%s1872_s1 + $0x4a8] sm:$0xff] %v336_v21  ;;  %v340_v23 = vld [vmem:[%s1871_s0 + $0x4b8] sm:$0xff]  ;;  %v342_v24 = vld [vmem:[%s1871_s0 + $0x4c0] sm:$0xff] }
  0x4d   :  { %339 = vst [vmem:[%s1872_s1 + $0x4b0] sm:$0xff] %v338_v22  ;;  %341 = vst [vmem:[%s1872_s1 + $0x4b8] sm:$0xff] %v340_v23  ;;  %v344_v25 = vld [vmem:[%s1871_s0 + $0x4c8] sm:$0xff]  ;;  %v346_v26 = vld [vmem:[%s1871_s0 + $0x4d0] sm:$0xff] }
  0x4e   :  { %343 = vst [vmem:[%s1872_s1 + $0x4c0] sm:$0xff] %v342_v24  ;;  %v348_v27 = vld [vmem:[%s1871_s0 + $0x4d8] sm:$0xff]  ;;  %345 = vst [vmem:[%s1872_s1 + $0x4c8] sm:$0xff] %v344_v25  ;;  %v350_v28 = vld [vmem:[%s1871_s0 + $0x4e0] sm:$0xff] }
  0x4f   :  { %347 = vst [vmem:[%s1872_s1 + $0x4d0] sm:$0xff] %v346_v26  ;;  %349 = vst [vmem:[%s1872_s1 + $0x4d8] sm:$0xff] %v348_v27  ;;  %v352_v29 = vld [vmem:[%s1871_s0 + $0x4e8] sm:$0xff]  ;;  %v354_v30 = vld [vmem:[%s1871_s0 + $0x4f0] sm:$0xff] }
  0x50   :  { %351 = vst [vmem:[%s1872_s1 + $0x4e0] sm:$0xff] %v350_v28  ;;  %353 = vst [vmem:[%s1872_s1 + $0x4e8] sm:$0xff] %v352_v29  ;;  %v356_v31 = vld [vmem:[%s1871_s0 + $0x4f8] sm:$0xff]  ;;  %v358_v32 = vld [vmem:[%s1871_s0 + $0x500] sm:$0xff] }
  0x51   :  { %355 = vst [vmem:[%s1872_s1 + $0x4f0] sm:$0xff] %v354_v30  ;;  %v360_v33 = vld [vmem:[%s1871_s0 + $0x508] sm:$0xff]  ;;  %357 = vst [vmem:[%s1872_s1 + $0x4f8] sm:$0xff] %v356_v31  ;;  %v362_v34 = vld [vmem:[%s1871_s0 + $0x510] sm:$0xff] }
  0x52   :  { %359 = vst [vmem:[%s1872_s1 + $0x500] sm:$0xff] %v358_v32  ;;  %361 = vst [vmem:[%s1872_s1 + $0x508] sm:$0xff] %v360_v33  ;;  %v364_v35 = vld [vmem:[%s1871_s0 + $0x518] sm:$0xff]  ;;  %v366_v36 = vld [vmem:[%s1871_s0 + $0x520] sm:$0xff] }
  0x53   :  { %363 = vst [vmem:[%s1872_s1 + $0x510] sm:$0xff] %v362_v34  ;;  %365 = vst [vmem:[%s1872_s1 + $0x518] sm:$0xff] %v364_v35  ;;  %v368_v37 = vld [vmem:[%s1871_s0 + $0x528] sm:$0xff]  ;;  %v370_v38 = vld [vmem:[%s1871_s0 + $0x530] sm:$0xff] }
  0x54   :  { %367 = vst [vmem:[%s1872_s1 + $0x520] sm:$0xff] %v366_v36  ;;  %v372_v39 = vld [vmem:[%s1871_s0 + $0x538] sm:$0xff]  ;;  %369 = vst [vmem:[%s1872_s1 + $0x528] sm:$0xff] %v368_v37  ;;  %v374_v40 = vld [vmem:[%s1871_s0 + $0x540] sm:$0xff] }
  0x55   :  { %371 = vst [vmem:[%s1872_s1 + $0x530] sm:$0xff] %v370_v38  ;;  %373 = vst [vmem:[%s1872_s1 + $0x538] sm:$0xff] %v372_v39  ;;  %v376_v41 = vld [vmem:[%s1871_s0 + $0x548] sm:$0xff]  ;;  %v378_v42 = vld [vmem:[%s1871_s0 + $0x550] sm:$0xff] }
  0x56   :  { %375 = vst [vmem:[%s1872_s1 + $0x540] sm:$0xff] %v374_v40  ;;  %377 = vst [vmem:[%s1872_s1 + $0x548] sm:$0xff] %v376_v41  ;;  %v380_v43 = vld [vmem:[%s1871_s0 + $0x558] sm:$0xff]  ;;  %v382_v44 = vld [vmem:[%s1871_s0 + $0x560] sm:$0xff] }
  0x57   :  { %379 = vst [vmem:[%s1872_s1 + $0x550] sm:$0xff] %v378_v42  ;;  %v384_v45 = vld [vmem:[%s1871_s0 + $0x568] sm:$0xff]  ;;  %381 = vst [vmem:[%s1872_s1 + $0x558] sm:$0xff] %v380_v43  ;;  %v386_v46 = vld [vmem:[%s1871_s0 + $0x570] sm:$0xff] }
  0x58   :  { %383 = vst [vmem:[%s1872_s1 + $0x560] sm:$0xff] %v382_v44  ;;  %385 = vst [vmem:[%s1872_s1 + $0x568] sm:$0xff] %v384_v45  ;;  %v388_v47 = vld [vmem:[%s1871_s0 + $0x578] sm:$0xff]  ;;  %v390_v48 = vld [vmem:[%s1871_s0 + $0x580] sm:$0xff] }
  0x59   :  { %387 = vst [vmem:[%s1872_s1 + $0x570] sm:$0xff] %v386_v46  ;;  %389 = vst [vmem:[%s1872_s1 + $0x578] sm:$0xff] %v388_v47  ;;  %v392_v49 = vld [vmem:[%s1871_s0 + $0x588] sm:$0xff]  ;;  %v394_v50 = vld [vmem:[%s1871_s0 + $0x590] sm:$0xff] }
  0x5a   :  { %391 = vst [vmem:[%s1872_s1 + $0x580] sm:$0xff] %v390_v48  ;;  %v396_v51 = vld [vmem:[%s1871_s0 + $0x598] sm:$0xff]  ;;  %393 = vst [vmem:[%s1872_s1 + $0x588] sm:$0xff] %v392_v49  ;;  %v398_v52 = vld [vmem:[%s1871_s0 + $0x5a0] sm:$0xff] }
  0x5b   :  { %395 = vst [vmem:[%s1872_s1 + $0x590] sm:$0xff] %v394_v50  ;;  %397 = vst [vmem:[%s1872_s1 + $0x598] sm:$0xff] %v396_v51  ;;  %v400_v53 = vld [vmem:[%s1871_s0 + $0x5a8] sm:$0xff]  ;;  %v402_v54 = vld [vmem:[%s1871_s0 + $0x5b0] sm:$0xff] }
  0x5c   :  { %399 = vst [vmem:[%s1872_s1 + $0x5a0] sm:$0xff] %v398_v52  ;;  %401 = vst [vmem:[%s1872_s1 + $0x5a8] sm:$0xff] %v400_v53  ;;  %v404_v55 = vld [vmem:[%s1871_s0 + $0x5b8] sm:$0xff]  ;;  %v406_v56 = vld [vmem:[%s1871_s0 + $0x5c0] sm:$0xff] }
  0x5d   :  { %403 = vst [vmem:[%s1872_s1 + $0x5b0] sm:$0xff] %v402_v54  ;;  %v408_v57 = vld [vmem:[%s1871_s0 + $0x5c8] sm:$0xff]  ;;  %405 = vst [vmem:[%s1872_s1 + $0x5b8] sm:$0xff] %v404_v55  ;;  %v410_v58 = vld [vmem:[%s1871_s0 + $0x5d0] sm:$0xff] }
  0x5e   :  { %407 = vst [vmem:[%s1872_s1 + $0x5c0] sm:$0xff] %v406_v56  ;;  %409 = vst [vmem:[%s1872_s1 + $0x5c8] sm:$0xff] %v408_v57  ;;  %v412_v59 = vld [vmem:[%s1871_s0 + $0x5d8] sm:$0xff]  ;;  %v414_v60 = vld [vmem:[%s1871_s0 + $0x5e0] sm:$0xff] }
  0x5f   :  { %411 = vst [vmem:[%s1872_s1 + $0x5d0] sm:$0xff] %v410_v58  ;;  %413 = vst [vmem:[%s1872_s1 + $0x5d8] sm:$0xff] %v412_v59  ;;  %v416_v61 = vld [vmem:[%s1871_s0 + $0x5e8] sm:$0xff]  ;;  %v418_v62 = vld [vmem:[%s1871_s0 + $0x5f0] sm:$0xff] }
  0x60   :  { %415 = vst [vmem:[%s1872_s1 + $0x5e0] sm:$0xff] %v414_v60  ;;  %v420_v63 = vld [vmem:[%s1871_s0 + $0x5f8] sm:$0xff]  ;;  %417 = vst [vmem:[%s1872_s1 + $0x5e8] sm:$0xff] %v416_v61  ;;  %v422_v0 = vld [vmem:[%s1871_s0 + $0x600] sm:$0xff] }
  0x61   :  { %419 = vst [vmem:[%s1872_s1 + $0x5f0] sm:$0xff] %v418_v62  ;;  %421 = vst [vmem:[%s1872_s1 + $0x5f8] sm:$0xff] %v420_v63  ;;  %v424_v1 = vld [vmem:[%s1871_s0 + $0x608] sm:$0xff]  ;;  %v426_v2 = vld [vmem:[%s1871_s0 + $0x610] sm:$0xff] }
  0x62   :  { %423 = vst [vmem:[%s1872_s1 + $0x600] sm:$0xff] %v422_v0  ;;  %425 = vst [vmem:[%s1872_s1 + $0x608] sm:$0xff] %v424_v1  ;;  %v428_v3 = vld [vmem:[%s1871_s0 + $0x618] sm:$0xff]  ;;  %v430_v4 = vld [vmem:[%s1871_s0 + $0x620] sm:$0xff] }
  0x63   :  { %427 = vst [vmem:[%s1872_s1 + $0x610] sm:$0xff] %v426_v2  ;;  %v432_v5 = vld [vmem:[%s1871_s0 + $0x628] sm:$0xff]  ;;  %429 = vst [vmem:[%s1872_s1 + $0x618] sm:$0xff] %v428_v3  ;;  %v434_v6 = vld [vmem:[%s1871_s0 + $0x630] sm:$0xff] }
  0x64   :  { %431 = vst [vmem:[%s1872_s1 + $0x620] sm:$0xff] %v430_v4  ;;  %433 = vst [vmem:[%s1872_s1 + $0x628] sm:$0xff] %v432_v5  ;;  %v436_v7 = vld [vmem:[%s1871_s0 + $0x638] sm:$0xff]  ;;  %v438_v8 = vld [vmem:[%s1871_s0 + $0x640] sm:$0xff] }
  0x65   :  { %435 = vst [vmem:[%s1872_s1 + $0x630] sm:$0xff] %v434_v6  ;;  %437 = vst [vmem:[%s1872_s1 + $0x638] sm:$0xff] %v436_v7  ;;  %v440_v9 = vld [vmem:[%s1871_s0 + $0x648] sm:$0xff]  ;;  %v442_v10 = vld [vmem:[%s1871_s0 + $0x650] sm:$0xff] }
  0x66   :  { %439 = vst [vmem:[%s1872_s1 + $0x640] sm:$0xff] %v438_v8  ;;  %v444_v11 = vld [vmem:[%s1871_s0 + $0x658] sm:$0xff]  ;;  %441 = vst [vmem:[%s1872_s1 + $0x648] sm:$0xff] %v440_v9  ;;  %v446_v12 = vld [vmem:[%s1871_s0 + $0x660] sm:$0xff] }
  0x67   :  { %443 = vst [vmem:[%s1872_s1 + $0x650] sm:$0xff] %v442_v10  ;;  %445 = vst [vmem:[%s1872_s1 + $0x658] sm:$0xff] %v444_v11  ;;  %v448_v13 = vld [vmem:[%s1871_s0 + $0x668] sm:$0xff]  ;;  %v450_v14 = vld [vmem:[%s1871_s0 + $0x670] sm:$0xff] }
  0x68   :  { %447 = vst [vmem:[%s1872_s1 + $0x660] sm:$0xff] %v446_v12  ;;  %449 = vst [vmem:[%s1872_s1 + $0x668] sm:$0xff] %v448_v13  ;;  %v452_v15 = vld [vmem:[%s1871_s0 + $0x678] sm:$0xff]  ;;  %v454_v16 = vld [vmem:[%s1871_s0 + $0x680] sm:$0xff] }
  0x69   :  { %451 = vst [vmem:[%s1872_s1 + $0x670] sm:$0xff] %v450_v14  ;;  %v456_v17 = vld [vmem:[%s1871_s0 + $0x688] sm:$0xff]  ;;  %453 = vst [vmem:[%s1872_s1 + $0x678] sm:$0xff] %v452_v15  ;;  %v458_v18 = vld [vmem:[%s1871_s0 + $0x690] sm:$0xff] }
  0x6a   :  { %455 = vst [vmem:[%s1872_s1 + $0x680] sm:$0xff] %v454_v16  ;;  %457 = vst [vmem:[%s1872_s1 + $0x688] sm:$0xff] %v456_v17  ;;  %v460_v19 = vld [vmem:[%s1871_s0 + $0x698] sm:$0xff]  ;;  %v462_v20 = vld [vmem:[%s1871_s0 + $0x6a0] sm:$0xff] }
  0x6b   :  { %459 = vst [vmem:[%s1872_s1 + $0x690] sm:$0xff] %v458_v18  ;;  %461 = vst [vmem:[%s1872_s1 + $0x698] sm:$0xff] %v460_v19  ;;  %v464_v21 = vld [vmem:[%s1871_s0 + $0x6a8] sm:$0xff]  ;;  %v466_v22 = vld [vmem:[%s1871_s0 + $0x6b0] sm:$0xff] }
  0x6c   :  { %463 = vst [vmem:[%s1872_s1 + $0x6a0] sm:$0xff] %v462_v20  ;;  %v468_v23 = vld [vmem:[%s1871_s0 + $0x6b8] sm:$0xff]  ;;  %465 = vst [vmem:[%s1872_s1 + $0x6a8] sm:$0xff] %v464_v21  ;;  %v470_v24 = vld [vmem:[%s1871_s0 + $0x6c0] sm:$0xff] }
  0x6d   :  { %467 = vst [vmem:[%s1872_s1 + $0x6b0] sm:$0xff] %v466_v22  ;;  %469 = vst [vmem:[%s1872_s1 + $0x6b8] sm:$0xff] %v468_v23  ;;  %v472_v25 = vld [vmem:[%s1871_s0 + $0x6c8] sm:$0xff]  ;;  %v474_v26 = vld [vmem:[%s1871_s0 + $0x6d0] sm:$0xff] }
  0x6e   :  { %471 = vst [vmem:[%s1872_s1 + $0x6c0] sm:$0xff] %v470_v24  ;;  %473 = vst [vmem:[%s1872_s1 + $0x6c8] sm:$0xff] %v472_v25  ;;  %v476_v27 = vld [vmem:[%s1871_s0 + $0x6d8] sm:$0xff]  ;;  %v478_v28 = vld [vmem:[%s1871_s0 + $0x6e0] sm:$0xff] }
  0x6f   :  { %475 = vst [vmem:[%s1872_s1 + $0x6d0] sm:$0xff] %v474_v26  ;;  %v480_v29 = vld [vmem:[%s1871_s0 + $0x6e8] sm:$0xff]  ;;  %477 = vst [vmem:[%s1872_s1 + $0x6d8] sm:$0xff] %v476_v27  ;;  %v482_v30 = vld [vmem:[%s1871_s0 + $0x6f0] sm:$0xff] }
  0x70   :  { %479 = vst [vmem:[%s1872_s1 + $0x6e0] sm:$0xff] %v478_v28  ;;  %481 = vst [vmem:[%s1872_s1 + $0x6e8] sm:$0xff] %v480_v29  ;;  %v484_v31 = vld [vmem:[%s1871_s0 + $0x6f8] sm:$0xff] }
  0x71   :  { %483 = vst [vmem:[%s1872_s1 + $0x6f0] sm:$0xff] %v482_v30  ;;  %485 = vst [vmem:[%s1872_s1 + $0x6f8] sm:$0xff] %v484_v31 }
  0x72   :  { %493 = vsyncadd [#allocation2], 28672 }
  0x73   :  { %515 = dma.done.wait [#allocation2], 28672 }
  0x74   :  { %516 = vsyncadd [#allocation2], 4294938624 }
  0x75   :  { %500 = vsyncmov [#allocation2] }
  0x78   :  { %s501_s3 = vpop.sfrf %500 }
  0x79   :  { %p514_p0 = scmp.ne.s32.totalorder %s501_s3, 0 }
  0x7b   :  { %505 = shalt.err (%p514_p0)  }

</bundles_post_ra>
